<compile_context>
chip_gen: v5e
topology: v5e:2x2
jax: 0.10.0
libtpu: 0.0.40
codegen_flags: <defaults>
</compile_context>

<pallas_src>
import functools
import math

import jax
import jax.numpy as jnp
from jax.experimental import pallas as pl
from jax.experimental.pallas import tpu as pltpu

N_CONST = 1.0
M_CONST = 11008.0

_LANE = 128
_SUBLANE = 8


def _align_mi_kernel(lm_ref, gp_ref, gn_ref,
                     wlm_ref, blm_ref, wg_ref, bg_ref,
                     out_ref, *, tile_b, batch, c, log_c):
    core = pl.program_id(0)
    step = pl.program_id(1)
    tiles_per_core = pl.num_programs(1)
    tile_idx = core * tiles_per_core + step

    # ---- Linear projections (MXU, f32 accumulation). The two gnn-side matmuls
    # share W_gnn, so fuse them into a single taller matmul.
    lm = jnp.dot(lm_ref[...], wlm_ref[...],
                 preferred_element_type=jnp.float32) + blm_ref[...]
    g_both = jnp.concatenate([gp_ref[...], gn_ref[...]], axis=0)
    g_proj = jnp.dot(g_both, wg_ref[...],
                     preferred_element_type=jnp.float32) + bg_ref[...]
    gp = g_proj[:tile_b]
    gn = g_proj[tile_b:]

    # ---- Fold the row-wise L2 norms into the row dots:
    #        cos(a, b) = <a, b> * rsqrt(|a|^2 * |b|^2)
    lm_sq = jnp.sum(lm * lm, axis=-1, keepdims=True)
    gp_sq = jnp.sum(gp * gp, axis=-1, keepdims=True)
    gn_sq = jnp.sum(gn * gn, axis=-1, keepdims=True)
    s_pos = jnp.sum(lm * gp, axis=-1, keepdims=True) * jax.lax.rsqrt(lm_sq * gp_sq)
    s_neg = jnp.sum(lm * gn, axis=-1, keepdims=True) * jax.lax.rsqrt(lm_sq * gn_sq)

    # ---- Stable, algebraically identical score math.
    t_pos = jnp.log(1.0 + c * jnp.exp(-s_pos))
    t_neg = jnp.log(1.0 + c * jnp.exp(-s_neg))
    pos_scores = -t_pos                      # log(e^s / (e^s + c))
    neg_scores = log_c - s_neg - t_neg       # log(1 - e^s / (e^s + c))

    # ---- Mask batch-padding rows and reduce this tile to a scalar partial sum.
    rows = tile_idx * tile_b + jax.lax.broadcasted_iota(jnp.int32, (tile_b, 1), 0)
    valid = rows < batch
    tile_sum = jnp.sum(jnp.where(valid, pos_scores + neg_scores, 0.0))

    contrib = jnp.full(out_ref.shape, tile_sum, dtype=jnp.float32)

    @pl.when(step == 0)
    def _():
        out_ref[...] = contrib

    @pl.when(step > 0)
    def _():
        out_ref[...] = out_ref[...] + contrib


def _round_up(n, m):
    return ((n + m - 1) // m) * m


def align_mutual_info(lm_embeds, gnn_embeds, neg_gnn_embeds,
                      w_lm, b_lm, w_gnn, b_gnn,
                      *, tile_b=1024, num_cores=2):
    """Returns the scalar AlignMutualInfo loss (shape ())."""
    batch, k_lm = lm_embeds.shape
    _, k_gnn = gnn_embeds.shape
    _, hidden = w_lm.shape

    # Lane-dense padding of feature / hidden dims (zero pad: numerically
    # identical for the matmuls, bias add, norms and dots).
    k_lm_p = _round_up(k_lm, _LANE)
    k_gnn_p = _round_up(k_gnn, _LANE)
    hidden_p = _round_up(hidden, _LANE)

    # Batch tiling: clamp the tile for tiny batches, and pad the batch so the
    # tile count splits evenly across the (megacore) parallel axis.
    tile_b = max(_SUBLANE, min(tile_b, _round_up(batch, _SUBLANE)))
    n_tiles = _round_up(pl.cdiv(batch, tile_b), num_cores)
    batch_p = n_tiles * tile_b
    tiles_per_core = n_tiles // num_cores

    f32 = jnp.float32

    def pad2(x, rows, cols):
        x = x.astype(f32)
        return jnp.pad(x, ((0, rows - x.shape[0]), (0, cols - x.shape[1])))

    lm_p = pad2(lm_embeds, batch_p, k_lm_p)
    gp_p = pad2(gnn_embeds, batch_p, k_gnn_p)
    gn_p = pad2(neg_gnn_embeds, batch_p, k_gnn_p)
    wlm_p = pad2(w_lm, k_lm_p, hidden_p)
    blm_p = pad2(b_lm.reshape(1, -1), 1, hidden_p)
    wg_p = pad2(w_gnn, k_gnn_p, hidden_p)
    bg_p = pad2(b_gnn.reshape(1, -1), 1, hidden_p)

    c = N_CONST / M_CONST
    kernel = functools.partial(_align_mi_kernel, tile_b=tile_b, batch=batch,
                               c=c, log_c=math.log(c))

    def emb_spec(kdim):
        return pl.BlockSpec((tile_b, kdim),
                            lambda core, i: (core * tiles_per_core + i, 0))

    def resident(shape):
        return pl.BlockSpec(shape, lambda core, i: (0, 0))

    flops = 2 * batch_p * (k_lm_p + 2 * k_gnn_p) * hidden_p + 12 * batch_p * hidden_p
    bytes_accessed = 4 * (batch_p * (k_lm_p + 2 * k_gnn_p)
                          + (k_lm_p + k_gnn_p + 2) * hidden_p
                          + num_cores * _SUBLANE * _LANE)

    out = pl.pallas_call(
        kernel,
        out_shape=jax.ShapeDtypeStruct((num_cores * _SUBLANE, _LANE), f32),
        grid_spec=pltpu.PrefetchScalarGridSpec(
            num_scalar_prefetch=0,
            grid=(num_cores, tiles_per_core),
            in_specs=[
                emb_spec(k_lm_p),                 # lm_embeds tile
                emb_spec(k_gnn_p),                # gnn_embeds tile
                emb_spec(k_gnn_p),                # neg_gnn_embeds tile
                resident((k_lm_p, hidden_p)),     # W_lm   (resident)
                resident((1, hidden_p)),          # b_lm   (resident)
                resident((k_gnn_p, hidden_p)),    # W_gnn  (resident)
                resident((1, hidden_p)),          # b_gnn  (resident)
            ],
            out_specs=pl.BlockSpec((_SUBLANE, _LANE), lambda core, i: (core, 0)),
        ),
        compiler_params=pltpu.CompilerParams(
            dimension_semantics=("parallel", "arbitrary")),
        cost_estimate=pl.CostEstimate(flops=flops,
                                      transcendentals=6 * batch_p,
                                      bytes_accessed=bytes_accessed),
    )(lm_p, gp_p, gn_p, wlm_p, blm_p, wg_p, bg_p)

    # Every element of core c's (8,128) block holds that core's partial sum.
    partials = out[::_SUBLANE, 0]
    return -(jnp.sum(partials) / batch)


def _reference(lm_embeds, gnn_embeds, neg_gnn_embeds, w_lm, b_lm, w_gnn, b_gnn):
    c = N_CONST / M_CONST
    log_c = math.log(c)

    def l2norm(x):
        return x / jnp.linalg.norm(x, axis=-1, keepdims=True)

    lm = l2norm(lm_embeds @ w_lm + b_lm)
    gp = l2norm(gnn_embeds @ w_gnn + b_gnn)
    gn = l2norm(neg_gnn_embeds @ w_gnn + b_gnn)
    s_pos = jnp.sum(lm * gp, axis=-1)
    s_neg = jnp.sum(lm * gn, axis=-1)
    # Algebraically identical, numerically stable form of the torch formulas:
    #   log(e^s/(e^s+c)) = -log(1+c e^-s);  log(1-e^s/(e^s+c)) = log c - s - log(1+c e^-s)
    pos = -jnp.log(1.0 + c * jnp.exp(-s_pos))
    neg = log_c - s_neg - jnp.log(1.0 + c * jnp.exp(-s_neg))
    return -(jnp.mean(pos) + jnp.mean(neg))


if __name__ == "__main__":
    # Small synthetic shapes consistent with the module's forward.
    batch = 8
    lm_embed_size = 32
    gnn_embed_size = 24
    hidden_size = 32

    key = jax.random.PRNGKey(0)
    k = jax.random.split(key, 7)

    lm_embeds = jax.random.normal(k[0], (batch, lm_embed_size), jnp.float32)
    gnn_embeds = jax.random.normal(k[1], (batch, gnn_embed_size), jnp.float32)
    neg_gnn_embeds = jax.random.normal(k[2], (batch, gnn_embed_size), jnp.float32)

    # Deterministic parameter init (uniform, torch-Linear-like scale).
    lim_lm = 1.0 / (lm_embed_size ** 0.5)
    lim_gnn = 1.0 / (gnn_embed_size ** 0.5)
    w_lm = jax.random.uniform(k[3], (lm_embed_size, hidden_size),
                              jnp.float32, -lim_lm, lim_lm)
    b_lm = jax.random.uniform(k[4], (1, hidden_size),
                              jnp.float32, -lim_lm, lim_lm)
    w_gnn = jax.random.uniform(k[5], (gnn_embed_size, hidden_size),
                               jnp.float32, -lim_gnn, lim_gnn)
    b_gnn = jax.random.uniform(k[6], (1, hidden_size),
                               jnp.float32, -lim_gnn, lim_gnn)

    loss = align_mutual_info(lm_embeds, gnn_embeds, neg_gnn_embeds,
                             w_lm, b_lm, w_gnn, b_gnn)
    loss = jax.block_until_ready(loss)

    ref = _reference(lm_embeds, gnn_embeds, neg_gnn_embeds,
                     w_lm, b_lm, w_gnn, b_gnn)
    assert jnp.allclose(loss, ref, rtol=1e-5, atol=1e-4), (loss, ref)

    print("KERNEL_OK")
</pallas_src>

<mosaic_0001>
module attributes {stable_mosaic.version = 11 : i64} {
  func.func @_align_mi_kernel(%arg0: i32, %arg1: i32, %arg2: memref<8x128xf32, #tpu.memory_space<vmem>>, %arg3: memref<8x128xf32, #tpu.memory_space<vmem>>, %arg4: memref<8x128xf32, #tpu.memory_space<vmem>>, %arg5: memref<128x128xf32, #tpu.memory_space<vmem>>, %arg6: memref<1x128xf32, #tpu.memory_space<vmem>>, %arg7: memref<128x128xf32, #tpu.memory_space<vmem>>, %arg8: memref<1x128xf32, #tpu.memory_space<vmem>>, %arg9: memref<8x128xf32, #tpu.memory_space<vmem>>) attributes {dimension_semantics = [#tpu.dimension_semantics<parallel>, #tpu.dimension_semantics<arbitrary>], iteration_bounds = array<i64: 2, 1>, scalar_prefetch = 0 : i64, scratch_operands = 0 : i64, tpu.core_type = #tpu.core_type<tc>, window_params = [{transform_indices = @transform_0, window_bounds = array<i64: 8, 128>}, {transform_indices = @transform_1, window_bounds = array<i64: 8, 128>}, {transform_indices = @transform_2, window_bounds = array<i64: 8, 128>}, {pipeline_mode = #tpu.pipeline_mode<synchronous>, transform_indices = @transform_3, window_bounds = array<i64: 128, 128>}, {pipeline_mode = #tpu.pipeline_mode<synchronous>, transform_indices = @transform_4, window_bounds = array<i64: 1, 128>}, {pipeline_mode = #tpu.pipeline_mode<synchronous>, transform_indices = @transform_5, window_bounds = array<i64: 128, 128>}, {pipeline_mode = #tpu.pipeline_mode<synchronous>, transform_indices = @transform_6, window_bounds = array<i64: 1, 128>}, {transform_indices = @transform_7, window_bounds = array<i64: 8, 128>}]} {
    %c1_i32 = arith.constant 1 : i32
    %0 = arith.muli %arg0, %c1_i32 : i32
    %1 = arith.addi %0, %arg1 : i32
    %c0 = arith.constant 0 : index
    %c0_0 = arith.constant 0 : index
    %2 = vector.load %arg2[%c0, %c0_0] : memref<8x128xf32, #tpu.memory_space<vmem>>, vector<8x128xf32>
    %c0_1 = arith.constant 0 : index
    %c0_2 = arith.constant 0 : index
    %3 = vector.load %arg5[%c0_1, %c0_2] : memref<128x128xf32, #tpu.memory_space<vmem>>, vector<128x128xf32>
    %cst = arith.constant dense<0.000000e+00> : vector<8x128xf32>
    %4 = tpu.matmul %2, %3, %cst {dimension_numbers = #tpu.dot_dimension_numbers<[1], [0], [0], [1], [0, 0, 1, 1], [], []>} : vector<8x128xf32>, vector<128x128xf32>, vector<8x128xf32> -> vector<8x128xf32>
    %c0_3 = arith.constant 0 : index
    %c0_4 = arith.constant 0 : index
    %5 = vector.load %arg6[%c0_3, %c0_4] : memref<1x128xf32, #tpu.memory_space<vmem>>, vector<1x128xf32>
    %6 = vector.broadcast %5 : vector<1x128xf32> to vector<8x128xf32>
    %7 = arith.addf %4, %6 : vector<8x128xf32>
    %c0_5 = arith.constant 0 : index
    %c0_6 = arith.constant 0 : index
    %8 = vector.load %arg3[%c0_5, %c0_6] : memref<8x128xf32, #tpu.memory_space<vmem>>, vector<8x128xf32>
    %c0_7 = arith.constant 0 : index
    %c0_8 = arith.constant 0 : index
    %9 = vector.load %arg4[%c0_7, %c0_8] : memref<8x128xf32, #tpu.memory_space<vmem>>, vector<8x128xf32>
    %10 = tpu.concatenate %8, %9 in 0 : vector<8x128xf32>, vector<8x128xf32> -> vector<16x128xf32>
    %c0_9 = arith.constant 0 : index
    %c0_10 = arith.constant 0 : index
    %11 = vector.load %arg7[%c0_9, %c0_10] : memref<128x128xf32, #tpu.memory_space<vmem>>, vector<128x128xf32>
    %cst_11 = arith.constant dense<0.000000e+00> : vector<16x128xf32>
    %12 = tpu.matmul %10, %11, %cst_11 {dimension_numbers = #tpu.dot_dimension_numbers<[1], [0], [0], [1], [0, 0, 1, 1], [], []>} : vector<16x128xf32>, vector<128x128xf32>, vector<16x128xf32> -> vector<16x128xf32>
    %c0_12 = arith.constant 0 : index
    %c0_13 = arith.constant 0 : index
    %13 = vector.load %arg8[%c0_12, %c0_13] : memref<1x128xf32, #tpu.memory_space<vmem>>, vector<1x128xf32>
    %14 = vector.broadcast %13 : vector<1x128xf32> to vector<16x128xf32>
    %15 = arith.addf %12, %14 : vector<16x128xf32>
    %16 = vector.extract_strided_slice %15 {offsets = [0, 0], sizes = [8, 128], strides = [1, 1]} : vector<16x128xf32> to vector<8x128xf32>
    %17 = vector.extract_strided_slice %15 {offsets = [8, 0], sizes = [8, 128], strides = [1, 1]} : vector<16x128xf32> to vector<8x128xf32>
    %18 = arith.mulf %7, %7 : vector<8x128xf32>
    %cst_14 = arith.constant dense<0.000000e+00> : vector<8xf32>
    %19 = vector.multi_reduction <add>, %18, %cst_14 [1] : vector<8x128xf32> to vector<8xf32>
    %20 = vector.shape_cast %19 : vector<8xf32> to vector<8x1xf32>
    %21 = arith.mulf %16, %16 : vector<8x128xf32>
    %cst_15 = arith.constant dense<0.000000e+00> : vector<8xf32>
    %22 = vector.multi_reduction <add>, %21, %cst_15 [1] : vector<8x128xf32> to vector<8xf32>
    %23 = vector.shape_cast %22 : vector<8xf32> to vector<8x1xf32>
    %24 = arith.mulf %17, %17 : vector<8x128xf32>
    %cst_16 = arith.constant dense<0.000000e+00> : vector<8xf32>
    %25 = vector.multi_reduction <add>, %24, %cst_16 [1] : vector<8x128xf32> to vector<8xf32>
    %26 = vector.shape_cast %25 : vector<8xf32> to vector<8x1xf32>
    %27 = arith.mulf %7, %16 : vector<8x128xf32>
    %cst_17 = arith.constant dense<0.000000e+00> : vector<8xf32>
    %28 = vector.multi_reduction <add>, %27, %cst_17 [1] : vector<8x128xf32> to vector<8xf32>
    %29 = vector.shape_cast %28 : vector<8xf32> to vector<8x1xf32>
    %30 = arith.mulf %20, %23 : vector<8x1xf32>
    %31 = math.rsqrt %30 : vector<8x1xf32>
    %32 = arith.mulf %29, %31 : vector<8x1xf32>
    %33 = arith.mulf %7, %17 : vector<8x128xf32>
    %cst_18 = arith.constant dense<0.000000e+00> : vector<8xf32>
    %34 = vector.multi_reduction <add>, %33, %cst_18 [1] : vector<8x128xf32> to vector<8xf32>
    %35 = vector.shape_cast %34 : vector<8xf32> to vector<8x1xf32>
    %36 = arith.mulf %20, %26 : vector<8x1xf32>
    %37 = math.rsqrt %36 : vector<8x1xf32>
    %38 = arith.mulf %35, %37 : vector<8x1xf32>
    %cst_19 = arith.constant 0.000000e+00 : f32
    %39 = vector.broadcast %cst_19 : f32 to vector<8x1xf32>
    %40 = arith.subf %39, %32 : vector<8x1xf32>
    %41 = math.exp %40 : vector<8x1xf32>
    %cst_20 = arith.constant 9.08430229E-5 : f32
    %42 = vector.broadcast %cst_20 : f32 to vector<8x1xf32>
    %43 = arith.mulf %42, %41 : vector<8x1xf32>
    %cst_21 = arith.constant 1.000000e+00 : f32
    %44 = vector.broadcast %cst_21 : f32 to vector<8x1xf32>
    %45 = arith.addf %44, %43 : vector<8x1xf32>
    %46 = math.log %45 : vector<8x1xf32>
    %cst_22 = arith.constant 0.000000e+00 : f32
    %47 = vector.broadcast %cst_22 : f32 to vector<8x1xf32>
    %48 = arith.subf %47, %38 : vector<8x1xf32>
    %49 = math.exp %48 : vector<8x1xf32>
    %cst_23 = arith.constant 9.08430229E-5 : f32
    %50 = vector.broadcast %cst_23 : f32 to vector<8x1xf32>
    %51 = arith.mulf %50, %49 : vector<8x1xf32>
    %cst_24 = arith.constant 1.000000e+00 : f32
    %52 = vector.broadcast %cst_24 : f32 to vector<8x1xf32>
    %53 = arith.addf %52, %51 : vector<8x1xf32>
    %54 = math.log %53 : vector<8x1xf32>
    %cst_25 = arith.constant 0.000000e+00 : f32
    %55 = vector.broadcast %cst_25 : f32 to vector<8x1xf32>
    %56 = arith.subf %55, %46 : vector<8x1xf32>
    %cst_26 = arith.constant -9.30637741 : f32
    %57 = vector.broadcast %cst_26 : f32 to vector<8x1xf32>
    %58 = arith.subf %57, %38 : vector<8x1xf32>
    %59 = arith.subf %58, %54 : vector<8x1xf32>
    %c8_i32 = arith.constant 8 : i32
    %60 = arith.muli %1, %c8_i32 : i32
    %61 = tpu.iota {dimensions = array<i32: 0>} : vector<8x1xi32>
    %62 = vector.broadcast %60 : i32 to vector<8x1xi32>
    %63 = arith.addi %62, %61 : vector<8x1xi32>
    %c8_i32_27 = arith.constant 8 : i32
    %64 = vector.broadcast %c8_i32_27 : i32 to vector<8x1xi32>
    %65 = arith.cmpi slt, %63, %64 : vector<8x1xi32>
    %66 = arith.addf %56, %59 : vector<8x1xf32>
    %cst_28 = arith.constant 0.000000e+00 : f32
    %67 = vector.broadcast %cst_28 : f32 to vector<8x1xf32>
    %68 = arith.select %65, %66, %67 : vector<8x1xi1>, vector<8x1xf32>
    %69 = vector.shape_cast %68 : vector<8x1xf32> to vector<1x8x1xf32>
    %cst_29 = arith.constant dense<0.000000e+00> : vector<1xf32>
    %70 = vector.multi_reduction <add>, %69, %cst_29 [1, 2] : vector<1x8x1xf32> to vector<1xf32>
    %71 = vector.shape_cast %70 : vector<1xf32> to vector<1x1x1xf32>
    %72 = vector.extract %71[0, 0, 0] : f32 from vector<1x1x1xf32>
    %73 = vector.broadcast %72 : f32 to vector<8x128xf32>
    %c0_i32 = arith.constant 0 : i32
    %74 = arith.cmpi eq, %arg1, %c0_i32 : i32
    %75 = arith.extui %74 : i1 to i32
    %c0_i32_30 = arith.constant 0 : i32
    %76 = arith.cmpi ne, %75, %c0_i32_30 : i32
    scf.if %76 {
      %c0_33 = arith.constant 0 : index
      %c0_34 = arith.constant 0 : index
      %80 = vector.load %arg9[%c0_33, %c0_34] : memref<8x128xf32, #tpu.memory_space<vmem>>, vector<8x128xf32>
      tpu.vector_store %arg9[%c0_33, %c0_34], %73 {strides = array<i32>} : memref<8x128xf32, #tpu.memory_space<vmem>>, vector<8x128xf32>,
    } else {
    }
    %c0_i32_31 = arith.constant 0 : i32
    %77 = arith.cmpi sgt, %arg1, %c0_i32_31 : i32
    %78 = arith.extui %77 : i1 to i32
    %c0_i32_32 = arith.constant 0 : i32
    %79 = arith.cmpi ne, %78, %c0_i32_32 : i32
    scf.if %79 {
      %c0_33 = arith.constant 0 : index
      %c0_34 = arith.constant 0 : index
      %80 = vector.load %arg9[%c0_33, %c0_34] : memref<8x128xf32, #tpu.memory_space<vmem>>, vector<8x128xf32>
      %81 = arith.addf %80, %73 : vector<8x128xf32>
      %c0_35 = arith.constant 0 : index
      %c0_36 = arith.constant 0 : index
      %82 = vector.load %arg9[%c0_35, %c0_36] : memref<8x128xf32, #tpu.memory_space<vmem>>, vector<8x128xf32>
      tpu.vector_store %arg9[%c0_35, %c0_36], %81 {strides = array<i32>} : memref<8x128xf32, #tpu.memory_space<vmem>>, vector<8x128xf32>,
    } else {
    }
    return
  }
  func.func @transform_0(%arg0: i32, %arg1: i32) -> (i32, i32) {
    %c1_i32 = arith.constant 1 : i32
    %0 = arith.muli %arg0, %c1_i32 : i32
    %1 = arith.addi %0, %arg1 : i32
    %c0_i32 = arith.constant 0 : i32
    %c0_i32_0 = arith.constant 0 : i32
    return %1, %c0_i32 : i32, i32
  }
  func.func @transform_1(%arg0: i32, %arg1: i32) -> (i32, i32) {
    %c1_i32 = arith.constant 1 : i32
    %0 = arith.muli %arg0, %c1_i32 : i32
    %1 = arith.addi %0, %arg1 : i32
    %c0_i32 = arith.constant 0 : i32
    %c0_i32_0 = arith.constant 0 : i32
    return %1, %c0_i32 : i32, i32
  }
  func.func @transform_2(%arg0: i32, %arg1: i32) -> (i32, i32) {
    %c1_i32 = arith.constant 1 : i32
    %0 = arith.muli %arg0, %c1_i32 : i32
    %1 = arith.addi %0, %arg1 : i32
    %c0_i32 = arith.constant 0 : i32
    %c0_i32_0 = arith.constant 0 : i32
    return %1, %c0_i32 : i32, i32
  }
  func.func @transform_3(%arg0: i32, %arg1: i32) -> (i32, i32) {
    %c0_i32 = arith.constant 0 : i32
    %c0_i32_0 = arith.constant 0 : i32
    %c0_i32_1 = arith.constant 0 : i32
    return %c0_i32, %c0_i32_0 : i32, i32
  }
  func.func @transform_4(%arg0: i32, %arg1: i32) -> (i32, i32) {
    %c0_i32 = arith.constant 0 : i32
    %c0_i32_0 = arith.constant 0 : i32
    %c0_i32_1 = arith.constant 0 : i32
    return %c0_i32, %c0_i32_0 : i32, i32
  }
  func.func @transform_5(%arg0: i32, %arg1: i32) -> (i32, i32) {
    %c0_i32 = arith.constant 0 : i32
    %c0_i32_0 = arith.constant 0 : i32
    %c0_i32_1 = arith.constant 0 : i32
    return %c0_i32, %c0_i32_0 : i32, i32
  }
  func.func @transform_6(%arg0: i32, %arg1: i32) -> (i32, i32) {
    %c0_i32 = arith.constant 0 : i32
    %c0_i32_0 = arith.constant 0 : i32
    %c0_i32_1 = arith.constant 0 : i32
    return %c0_i32, %c0_i32_0 : i32, i32
  }
  func.func @transform_7(%arg0: i32, %arg1: i32) -> (i32, i32) {
    %c0_i32 = arith.constant 0 : i32
    %c0_i32_0 = arith.constant 0 : i32
    return %arg0, %c0_i32 : i32, i32
  }
}

</mosaic_0001>

<bundles_post_ra>
// kernel: tpu_custom_call.1
= control target key start
LH: loop header
LB: loop body
LE: loop exit
PB: predicated region body
PF: predicated region fallthrough
CT: control target
= control target key end

     0   :  { %s1404_s0 = inlined_call_operand.hbm [shape: f32[16,128], index: 0, kind: input, shape index: {}]   ;;  %s1405_s1 = inlined_call_operand.hbm [shape: f32[16,128], index: 1, kind: input, shape index: {}]   ;;  %s1406_s2 = inlined_call_operand.hbm [shape: f32[16,128], index: 2, kind: input, shape index: {}]   ;;  %s1407_s3 = inlined_call_operand.hbm [shape: f32[128,128], index: 3, kind: input, shape index: {}]   ;;  %s1408_s4 = inlined_call_operand.vmem [shape: f32[1,128], index: 4, kind: input, shape index: {}]   ;;  %s1409_s5 = inlined_call_operand.hbm [shape: f32[128,128], index: 5, kind: input, shape index: {}]   ;;  %s1410_s6 = inlined_call_operand.vmem [shape: f32[1,128], index: 6, kind: input, shape index: {}]   ;;  %s1411_s7 = inlined_call_operand.hbm [shape: f32[16,128], index: 7, kind: output, shape index: {}]  }
   0x1   :  { %1424 = sst [smem:[#allocation24_spill]] %s1405_s1 }
   0x2   :  { %1425 = sst [smem:[#allocation25_spill]] %s1407_s3 }
   0x3   :  { %1426 = sst [smem:[#allocation26_spill]] %s1409_s5 }
   0x4   :  { %1427 = sst [smem:[#allocation27_spill]] %s1411_s7 }
   0x5   :  { %12 = vsyncpa [#allocation3], 0 }
   0x6   :  { %14 = vsyncpa [#allocation3 + $0x1], 0 }
   0x7   :  { %15 = vsyncpa [#allocation6], 0 }
   0x8   :  { %17 = vsyncpa [#allocation6 + $0x1], 0 }
   0x9   :  { %18 = vsyncpa [#allocation9], 0 }
   0xa   :  { %19 = vsyncpa [#allocation4], 0 }
   0xb   :  { %21 = vsyncpa [#allocation4 + $0x1], 0  ;;  %s1199_s24 = smov 0   ;;  %s1201_s25 = smov 0  }
   0xc   :  { %s1203_s26 = smov 0   ;;  %s1205_s27 = smov 0  }
   0xd   :  { %s1207_s28 = smov 0   ;;  %s1209_s29 = smov 0  }
   0xe LB: > { %1428 = sst [smem:[#allocation16_spill]] %s1133_s24  ;;  %s1230_s30 = sadd.s32 4294967295, %s1153_s29   ;;  %s1153_s29 = sphi %s1209_s29, %s27_s29   ;;  %s1149_s28 = sphi %s1207_s28, %s1457_s28   ;;  %s1145_s27 = sphi %s1205_s27, %s1456_s27   ;;  %s1141_s26 = sphi %s1203_s26, %s1455_s26   ;;  %s1137_s25 = sphi %s1201_s25, %s1459_s25   ;;  %s1133_s24 = sphi %s1199_s24, %s1458_s24  }
   0xf   : > { %1429 = sst [smem:[#allocation17_spill]] %s1141_s26  ;;  %p764_p0 = scmp.ge.s32.totalorder %s1153_s29, 1 }
  0x10   : > { %1430 = sst [smem:[#allocation18_spill]] %s1149_s28  ;;  %p62_p1 = scmp.eq.s32.totalorder %s1230_s30, 0 }
  0x11   : > { %1431 = sst [smem:[#allocation19_spill]] %s1153_s29  ;;  %p238_p2 = scmp.lt.s32.totalorder %s1153_s29, 3 }
  0x12   : > { %s1432_s3 = sld [smem:[#allocation25_spill]]  ;;  %s1155_s12 = smov [#allocation8]  }
  0x13   : > { %p1238_p3 = pnand %p764_p0, %p238_p2  ;;  %s251_s13 = sshll.u32 %s1155_s12, 4  ;;  %s252_s13 = int_to_ptr.vmem [resolvable:$true] %s251_s13 }
  0x14   : > { %s1412_s15 = smov 128   ;;  %s1413_s16 = smov 8  }
  0x15   : > { %p820_p4 = pneg %p1238_p3  ;;  %s763_s17 = sadd.s32 4294967294, %s1153_s29  }
  0x16   : > { %s39_s18 = sadd.s32 1, %s1149_s28  ;;  %s48_s19 = sadd.s32 1, %s1141_s26 }
  0x17   : > { %p1246_p5 = pnand %p820_p4, %p62_p1  ;;  %p41_p7 = scmp.ge.s32.totalorder %s39_s18, 2 }
  0x18   : > { %s249_s10 = sshll.u32 %s1432_s3, 4  ;;  %p55_p8 = scmp.ne.s32.totalorder %s1141_s26, %s1137_s25  ;;  %s250_s10 = int_to_ptr.hbm [resolvable:$true] %s249_s10 }
  0x19   : > { %823 = dma.hbm_to_vmem [thread:$0]  (!%p1246_p5), %s250_s10, 2048, %s252_s13, [#allocation9], %s1412_s15, %s1412_s15, %s1413_s16  }
  0x1a   : > { %p56_p9 = scmp.eq.s32.totalorder %s1153_s29, 0  ;;  %p61_p10 = scmp.ne.s32.totalorder %s1137_s25, %s1133_s24 }
  0x1b   : > { %s1461_s18 = smov (%p41_p7, %s39_s18), 0  ;;  %p225_p13 = scmp.eq.s32.totalorder %s1230_s30, 1 }
  0x1c   : > { %1435 = sst [smem:[#allocation20_spill]] %s1461_s18  ;;  %p1266_p11 = por %p56_p9, %p55_p8 }
  0x1d   : > { %p1272_p12 = por %p62_p1, %p61_p10  ;;  %s45_s22 = ssub.s32 %s1149_s28, %s1461_s18 }
  0x1e   : > { %p46_p0 = scmp.eq.s32.totalorder %s45_s22, 0  ;;  %p231_p2 = scmp.eq.s32.totalorder %s763_s17, 1 }
  0x1f   : > { %p1279_p4 = por %p225_p13, %p55_p8  ;;  %p843_p7 = scmp.lt.s32.totalorder %s1153_s29, 2 }
  0x20   : > { %s1285_s8 = scalar_select %p46_p0, %s1141_s26, %s48_s19  }
  0x21   : > { %s1438_s23 = scalar_select %p1279_p4, 1, 0 }
  0x22   : > { %1440 = sst [smem:[#allocation22_spill]] %s1285_s8  ;;  %p1287_p9 = por %p231_p2, %p61_p10 }
  0x23   : > { %1439 = sst [smem:[#allocation21_spill]] %s1438_s23  ;;  %s285_s10 = sand.u32 1, %s1141_s26  }
  0x24   : > { %s1441_s9 = scalar_select %p1287_p9, 1, 0 }
  0x25   : > { %s1292_s12 = sshll.u32 %s285_s10, 3  ;;  %s769_s13 = sshll.u32 %s1149_s28, 3 }
  0x26   : > { %1442 = sst [smem:[#allocation23_spill]] %s1441_s9  ;;  %p1297_p6 = pnand %p843_p7, %p1266_p11 }
  0x27   : > { %s305_s22 = sand.u32 1, %s1153_s29   ;;  %s1444_s1 = sld [smem:[#allocation24_spill]] }
  0x28   : > { %s309_s18 = scalar_lea.vmem [#allocation5], %s1292_s12  ;;  %s306_s28 = scalar_lea.sflag [#allocation6], %s305_s22 }
  0x29   : > { %s318_s8 = sshll.u32 %s309_s18, 4  ;;  %s1445_s5 = sld [smem:[#allocation26_spill]]  ;;  %s319_s8 = int_to_ptr.vmem [resolvable:$true] %s318_s8 }
  0x2a   : > { %s1158_s29 = smov [#allocation10]   ;;  %s1446_s15 = smov 8  }
  0x2b   : > { %s268_s24 = sshll.u32 %s1158_s29, 4  ;;  %s294_s22 = scalar_lea.hbm %s1404_s0, %s769_s13  ;;  %s269_s24 = int_to_ptr.vmem [resolvable:$true] %s268_s24 }
  0x2c   : > { %s286_s26 = scalar_lea.sflag [#allocation3], %s285_s10  ;;  %s334_s14 = scalar_lea.hbm %s1406_s2, %s769_s13 }
  0x2d   : > { %s314_s16 = scalar_lea.hbm %s1444_s1, %s769_s13  ;;  %s329_s7 = scalar_lea.vmem [#allocation7], %s1292_s12 }
  0x2e   : > { %s316_s3 = sshll.u32 %s314_s16, 4  ;;  %s1447_s16 = smov 128   ;;  %s317_s3 = int_to_ptr.hbm [resolvable:$true] %s316_s3 }
  0x2f   : > { %833 = dma.hbm_to_vmem [thread:$0]  (!%p1297_p6), %s317_s3, 128, %s319_s8, %s306_s28  }
  0x30   : > { %s266_s9 = sshll.u32 %s1445_s5, 4  ;;  %s296_s3 = sshll.u32 %s294_s22, 4  ;;  %s267_s9 = int_to_ptr.hbm [resolvable:$true] %s266_s9  ;;  %s297_s3 = int_to_ptr.hbm [resolvable:$true] %s296_s3 }
  0x31   : > { %826 = dma.hbm_to_vmem [thread:$0]  (!%p1246_p5), %s267_s9, 2048, %s269_s24, [#allocation9], %s1447_s16, %s1447_s16, %s1446_s15  }
  0x32   : > { %s289_s8 = scalar_lea.vmem [#allocation2], %s1292_s12  ;;  %s336_s5 = sshll.u32 %s334_s14, 4  ;;  %s337_s5 = int_to_ptr.hbm [resolvable:$true] %s336_s5 }
  0x33   : > { %s298_s1 = sshll.u32 %s289_s8, 4  ;;  %s338_s23 = sshll.u32 %s329_s7, 4  ;;  %s299_s1 = int_to_ptr.vmem [resolvable:$true] %s298_s1  ;;  %s339_s23 = int_to_ptr.vmem [resolvable:$true] %s338_s23 }
  0x34   : > { %830 = dma.hbm_to_vmem [thread:$0]  (!%p1297_p6), %s297_s3, 128, %s299_s1, %s286_s26  }
  0x35   : > { %836 = dma.hbm_to_vmem [thread:$0]  (!%p1297_p6), %s337_s5, 128, %s339_s23, %s306_s28  }
  0x36   : > { %347 = sbr.rel (%p1238_p3) target bundleno = 586 (0x24a), region = 48  ;;  %s1331_s24 = sand.u32 (!%p1238_p3), 1, %s1137_s25  }
  0x37   : > { %s1334_s1 = sshll.u32 (!%p1238_p3), %s1331_s24, 3  ;;  %s350_s9 = scalar_lea.sflag (!%p1238_p3), [#allocation3], %s1331_s24 }
  0x38   : > { %s353_s10 = scalar_lea.vmem (!%p1238_p3), [#allocation2], %s1334_s1 }
  0x3b   : > { %1116 = dma.done.wait (%p1272_p12), %s350_s9, 128  }
  0x3c   : > { %1118 = vsyncadd (%p1272_p12), %s350_s9, 4294967168  ;;  %s359_s5 = sand.u32 1, %s1230_s30   ;;  %s363_s28 = scalar_lea.vmem [#allocation5], %s1334_s1 }
  0x3d   : > { %s360_s7 = scalar_lea.sflag [#allocation6], %s359_s5 }
  0x3e   : > { %1120 = dma.done.wait (%p1272_p12), %s360_s7, 256  }
  0x3f   : > { %1122 = vsyncadd (%p1272_p12), %s360_s7, 4294967040  ;;  %s373_s11 = scalar_lea.vmem [#allocation7], %s1334_s1 }
  0x40   : > { %1124 = dma.done.wait (%p62_p1), [#allocation9], 4096  }
  0x41   : > { %1126 = vsyncadd (%p62_p1), [#allocation9], 4294963200  ;;  %v445_v0 = vld [vmem:[#allocation8 + $0x78] sm:$0xff]  ;;  %v444_v2 = vld [vmem:[#allocation8 + $0x70] sm:$0xff]  ;;  %s781_s13 = sshll.u32 %s1145_s27, 3  ;;  %vm579_vm7 = vcmask 7168  }
  0x42   : > { %v487_v1 = vld [vmem:[#allocation10 + $0x78] sm:$0xff]  ;;  %450 = vmatpush.msra.mxu0 %v445_v0  ;;  %v486_v3 = vld [vmem:[#allocation10 + $0x70] sm:$0xff]  ;;  %v443_v4 = vld [vmem:[#allocation8 + $0x68] sm:$0xff]  ;;  %s1449_s16 = sld [smem:[#allocation27_spill]]  ;;  %s424_s19 = scalar_lea.vmem [#allocation11], %s1334_s1 }
  0x43   : > { %492 = vmatpush.msra.mxu1 %v487_v1  ;;  %786 = vmatpush.msra.mxu2 %v487_v1  ;;  %v485_v5 = vld [vmem:[#allocation10 + $0x68] sm:$0xff]  ;;  %v442_v6 = vld [vmem:[#allocation8 + $0x60] sm:$0xff]  ;;  %v441_v8 = vld [vmem:[#allocation8 + $0x58] sm:$0xff]  ;;  %s616_s22 = sshll.u32 %s424_s19, 4  ;;  %s604_s26 = scalar_lea.sflag [#allocation4], %s1331_s24  ;;  %s617_s22 = int_to_ptr.vmem [resolvable:$true] %s616_s22 }
  0x44   : > { %451 = vmatpush.msra.mxu0 %v444_v2  ;;  %v484_v7 = vld [vmem:[#allocation10 + $0x60] sm:$0xff]  ;;  %v483_v9 = vld [vmem:[#allocation10 + $0x58] sm:$0xff]  ;;  %v440_v10 = vld [vmem:[#allocation8 + $0x50] sm:$0xff] }
  0x45   : > { %493 = vmatpush.msra.mxu1 %v486_v3  ;;  %787 = vmatpush.msra.mxu2 %v486_v3  ;;  %v482_v11 = vld [vmem:[#allocation10 + $0x50] sm:$0xff]  ;;  %v439_v12 = vld [vmem:[#allocation8 + $0x48] sm:$0xff]  ;;  %v438_v14 = vld [vmem:[#allocation8 + $0x40] sm:$0xff] }
  0x46   : > { %452 = vmatpush.msra.mxu0 %v443_v4  ;;  %v481_v13 = vld [vmem:[#allocation10 + $0x48] sm:$0xff]  ;;  %v480_v15 = vld [vmem:[#allocation10 + $0x40] sm:$0xff]  ;;  %v437_v16 = vld [vmem:[#allocation8 + $0x38] sm:$0xff] }
  0x47   : > { %494 = vmatpush.msra.mxu1 %v485_v5  ;;  %788 = vmatpush.msra.mxu2 %v485_v5  ;;  %v479_v17 = vld [vmem:[#allocation10 + $0x38] sm:$0xff]  ;;  %v436_v18 = vld [vmem:[#allocation8 + $0x30] sm:$0xff]  ;;  %v435_v20 = vld [vmem:[#allocation8 + $0x28] sm:$0xff] }
  0x48   : > { %453 = vmatpush.msra.mxu0 %v442_v6  ;;  %v478_v19 = vld [vmem:[#allocation10 + $0x30] sm:$0xff]  ;;  %v477_v21 = vld [vmem:[#allocation10 + $0x28] sm:$0xff]  ;;  %v434_v22 = vld [vmem:[#allocation8 + $0x20] sm:$0xff]  ;;  %s614_s18 = scalar_lea.hbm %s1449_s16, %s781_s13 }
  0x49   : > { %495 = vmatpush.msra.mxu1 %v484_v7  ;;  %789 = vmatpush.msra.mxu2 %v484_v7  ;;  %v476_v23 = vld [vmem:[#allocation10 + $0x20] sm:$0xff]  ;;  %v433_v24 = vld [vmem:[#allocation8 + $0x18] sm:$0xff]  ;;  %v432_v26 = vld [vmem:[#allocation8 + $0x10] sm:$0xff]  ;;  %s618_s3 = sshll.u32 %s614_s18, 4  ;;  %s619_s3 = int_to_ptr.hbm [resolvable:$true] %s618_s3 }
  0x4a   : > { %454 = vmatpush.msra.mxu0 %v441_v8  ;;  %v475_v25 = vld [vmem:[#allocation10 + $0x18] sm:$0xff]  ;;  %v474_v27 = vld [vmem:[#allocation10 + $0x10] sm:$0xff]  ;;  %v431_v28 = vld [vmem:[#allocation8 + $0x8] sm:$0xff]  ;;  %s1077_s29 = sshra.s32 %s619_s3, 4  ;;  %s1078_s29 = int_to_ptr.hbm [resolvable:$true] %s1077_s29 }
  0x4b   : > { %496 = vmatpush.msra.mxu1 %v483_v9  ;;  %790 = vmatpush.msra.mxu2 %v483_v9  ;;  %v473_v29 = vld [vmem:[#allocation10 + $0x8] sm:$0xff]  ;;  %v430_v30 = vld [vmem:[#allocation8] sm:$0xff]  ;;  %v429_v32 = vld [vmem:[%s353_s10] sm:$0xff]  ;;  %s1079_s20 = scalar_lea.hbm %s1078_s29, 8  ;;  %s1083_s10 = scalar_lea.hbm %s1449_s16, 16 }
  0x4c   : > { %455 = vmatpush.msra.mxu0 %v440_v10  ;;  %v472_v31 = vld [vmem:[#allocation10] sm:$0xff]  ;;  %v471_v34 = vld [vmem:[%s373_s11] sm:$0xff]  ;;  %p1080_p1 = scmp.ne.s32.totalorder %s1078_s29, %s1079_s20  ;;  %p1084_p6 = scmp.lt.s32.totalorder %s1078_s29, %s1449_s16 }
  0x4d   : > { %497 = vmatpush.msra.mxu1 %v482_v11  ;;  %791 = vmatpush.msra.mxu2 %v482_v11  ;;  %v470_v33 = vld [vmem:[%s363_s28] sm:$0xff]  ;;  %v899_v35 = vld [vmem:[%s1408_s4] ss:$0 sm:$0xff]  ;;  %p1085_p8 = scmp.lt.s32.totalorder %s1083_s10, %s1079_s20 }
  0x4e   : > { %456 = vmatpush.msra.mxu0 %v439_v12  ;;  %v900_v38 = vld [vmem:[%s1410_s6] ss:$0 sm:$0xff]  ;;  %p1081_p3 = pnand %p1080_p1, %p1279_p4 }
  0x4f   : > { %498 = vmatpush.msra.mxu1 %v481_v13  ;;  %792 = vmatpush.msra.mxu2 %v481_v13  ;;  %p1086_p10 = por %p1085_p8, %p1084_p6 }
  0x50   : > { %457 = vmatpush.msra.mxu0 %v438_v14  ;;  %p1082_p5 = pneg %p1081_p3 }
  0x51   : > { %499 = vmatpush.msra.mxu1 %v480_v15  ;;  %793 = vmatpush.msra.mxu2 %v480_v15 }
  0x52   : > { %458 = vmatpush.msra.mxu0 %v437_v16  ;;  %p1087_p11 = pnand %p1086_p10, %p1082_p5 }
  0x53   : > { %500 = vmatpush.msra.mxu1 %v479_v17  ;;  %794 = vmatpush.msra.mxu2 %v479_v17  ;;  %v572_v17 = vlaneseq }
  0x54   : > { %459 = vmatpush.msra.mxu0 %v436_v18 }
  0x55   : > { %501 = vmatpush.msra.mxu1 %v478_v19  ;;  %795 = vmatpush.msra.mxu2 %v478_v19  ;;  %v573_v18 = vshrl.u32 %v572_v17, 7  ;;  %v574_v19 = vstv %s781_s13 }
  0x56   : > { %460 = vmatpush.msra.mxu0 %v435_v20 }
  0x57   : > { %502 = vmatpush.msra.mxu1 %v477_v21  ;;  %796 = vmatpush.msra.mxu2 %v477_v21 }
  0x58   : > { %461 = vmatpush.msra.mxu0 %v434_v22 }
  0x59   : > { %503 = vmatpush.msra.mxu1 %v476_v23  ;;  %797 = vmatpush.msra.mxu2 %v476_v23  ;;  %v575_v23 = vadd.s32 %v574_v19, %v573_v18 }
  0x5a   : > { %462 = vmatpush.msra.mxu0 %v433_v24 }
  0x5b   : > { %504 = vmatpush.msra.mxu1 %v475_v25  ;;  %798 = vmatpush.msra.mxu2 %v475_v25  ;;  %vm576_vm6 = vcmp.lt.s32.totalorder %v575_v23, 8 }
  0x5c   : > { %463 = vmatpush.msra.mxu0 %v432_v26 }
  0x5d   : > { %505 = vmatpush.msra.mxu1 %v474_v27  ;;  %799 = vmatpush.msra.mxu2 %v474_v27 }
  0x5e   : > { %464 = vmatpush.msra.mxu0 %v431_v28 }
  0x5f   : > { %506 = vmatpush.msra.mxu1 %v473_v29  ;;  %800 = vmatpush.msra.mxu2 %v473_v29 }
  0x60   : > { %465 = vmatpush.msra.mxu0 %v430_v30 }
  0x61   : > { %507 = vmatpush.msra.mxu1 %v472_v31  ;;  %801 = vmatpush.msra.mxu2 %v472_v31 }
  0x62   : > { %466 = vmatmul.f32.vlgmr.msra.gmra.mxu0 %v429_v32  ;;  %508 = vmatmul.f32.vlgmr.msra.gmra.mxu1 %v470_v33 }
  0x63   : > { %511 = vmatmul.f32.vlgmr.msra.gmra.mxu2 %v471_v34 }
  0xdf   : > { %v467_v36 = vpop.f32.mrf.mxu0  ;;  %v509_v40 = vpop.f32.mrf.mxu1 }
  0xe0   : > { %v468_v37 = vadd.f32 %v899_v35, %v467_v36  ;;  %v510_v41 = vadd.f32 %v900_v38, %v509_v40 }
  0xe2   : > { %v515_v39 = vmul.f32 %v468_v37, %v468_v37  ;;  %v518_v44 = vmul.f32 %v510_v41, %v510_v41  ;;  %v524_v47 = vmul.f32 %v510_v41, %v468_v37 }
  0xe4   : > { %516 = vadd.xlane.f32.xlu0 %v515_v39 }
  0xe6   : > { %v512_v42 = vpop.f32.mrf.mxu2 }
  0xe7   : > { %v513_v43 = vadd.f32 %v900_v38, %v512_v42 }
  0xe9   : > { %v521_v45 = vmul.f32 %v513_v43, %v513_v43  ;;  %v539_v46 = vmul.f32 %v513_v43, %v468_v37 }
  0xeb   : > { %522 = vadd.xlane.f32.xlu1 %v521_v45  ;;  %540 = vadd.xlane.f32.xlu2 %v539_v46 }
  0xec   : > { %519 = vadd.xlane.f32.xlu0 %v518_v44 }
  0xf3   : > { %525 = vadd.xlane.f32.xlu1 %v524_v47 }
 0x157   : > { %v517_v48 = vpop.xlane.xlu0 %516 }
 0x15e   : > { %v523_v49 = vpop.xlane.xlu1 %522  ;;  %v541_v1 = vpop.xlane.xlu2 %540 }
 0x15f   : > { %v542_v50 = vmul.f32 %v523_v49, %v517_v48  ;;  %v520_v51 = vpop.xlane.xlu0 %519 }
 0x160   : > { %v527_v52 = vmul.f32 %v520_v51, %v517_v48 }
 0x161   : > { %901 = vrsqrt.f32 %v542_v50  ;;  %vm549_vm2 = vweird.f32 %v542_v50 }
 0x162   : > { %903 = vrsqrt.f32 %v527_v52  ;;  %vm534_vm4 = vweird.f32 %v527_v52 }
 0x166   : > { %v526_v4 = vpop.xlane.xlu1 %525 }
 0x167   : > { %v902_v53 = vpop.eup %901 }
 0x168   : > { %v904_v54 = vpop.eup %903  ;;  %v544_v55 = vmul.f32 %v902_v53, %v542_v50  ;;  %vm550_vm0 = vweird.f32 %v902_v53 }
 0x169   : > { %v529_v56 = vmul.f32 %v904_v54, %v527_v52  ;;  %vm535_vm1 = vweird.f32 %v904_v54  ;;  %vm551_vm3 = vmor %vm549_vm2, %vm550_vm0 }
 0x16a   : > { %v545_v57 = vmul.f32 %v902_v53, %v544_v55  ;;  %vm536_vm5 = vmor %vm534_vm4, %vm535_vm1 }
 0x16b   : > { %v530_v58 = vmul.f32 %v904_v54, %v529_v56 }
 0x16c   : > { %v546_v59 = vmul.f32 0.5, %v545_v57 }
 0x16d   : > { %v531_v60 = vmul.f32 0.5, %v530_v58 }
 0x16e   : > { %v547_v61 = vsub.f32 1.5, %v546_v59 }
 0x16f   : > { %v532_v62 = vsub.f32 1.5, %v531_v60 }
 0x170   : > { %v548_v63 = vmul.f32 %v902_v53, %v547_v61 }
 0x171   : > { %v533_v0 = vmul.f32 %v904_v54, %v532_v62 }
 0x172   : > { %v552_v2 = vsel %vm551_vm3, %v902_v53, %v548_v63 }
 0x173   : > { %v553_v3 = vmul.f32 %v552_v2, %v541_v1  ;;  %v537_v5 = vsel %vm536_vm5, %v904_v54, %v533_v0 }
 0x174   : > { %v538_v6 = vmul.f32 %v537_v5, %v526_v4 }
 0x175   : > { %v561_v7 = vsub.f32 0.0, %v553_v3  ;;  %v569_v24 = vsub.f32 -9.306377, %v553_v3 }
 0x176   : > { %v554_v8 = vsub.f32 0.0, %v538_v6 }
 0x177   : > { %v562_v9 = vmul.f32 1.442695, %v561_v7 }
 0x178   : > { %v555_v10 = vmul.f32 1.442695, %v554_v8 }
 0x179   : > { %905 = vpow2.f32 %v562_v9 }
 0x17a   : > { %907 = vpow2.f32 %v555_v10 }
 0x17f   : > { %v906_v11 = vpop.eup %905 }
 0x180   : > { %v908_v12 = vpop.eup %907  ;;  %v564_v13 = vmul.f32 9.084302e-05, %v906_v11 }
 0x181   : > { %v557_v14 = vmul.f32 9.084302e-05, %v908_v12 }
 0x182   : > { %v565_v15 = vadd.f32 1.0, %v564_v13 }
 0x183   : > { %v558_v16 = vadd.f32 1.0, %v557_v14 }
 0x184   : > { %909 = vlog2.f32 %v565_v15 }
 0x185   : > { %911 = vlog2.f32 %v558_v16 }
 0x18a   : > { %v910_v20 = vpop.eup %909 }
 0x18b   : > { %v912_v21 = vpop.eup %911  ;;  %v567_v22 = vmul.f32 0.6931472, %v910_v20 }
 0x18c   : > { %v560_v25 = vmul.f32 0.6931472, %v912_v21 }
 0x18d   : > { %v570_v26 = vsub.f32 %v569_v24, %v567_v22 }
 0x18e   : > { %v568_v27 = vsub.f32 0.0, %v560_v25 }
 0x190   : > { %v577_v28 = vadd.f32 %v570_v26, %v568_v27 }
 0x192   : > { %v578_v29 = vsel %vm576_vm6, %v577_v28, 0.0 }
 0x193   : > { %v580_v30 = vsel %vm579_vm7, %v578_v29, 0.0 }
 0x194   : > { %581 = vadd.xlane.f32.xlu2 %v580_v30 }
 0x207   : > { %v582_v31 = vpop.xlane.xlu2 %581 }
 0x208   : > { %v583_v32 = vrot.slane %v582_v31, 4 }
 0x20a   : > { %v584_v33 = vadd.f32 %v583_v32, %v582_v31 }
 0x20c   : > { %v585_v34 = vrot.slane %v584_v33, 2 }
 0x20e   : > { %v586_v35 = vadd.f32 %v585_v34, %v584_v33 }
 0x210   : > { %v587_v36 = vrot.slane %v586_v35, 1 }
 0x212   : > { %v588_v37 = vadd.f32 %v587_v36, %v586_v35 }
 0x214   : > { %802 = vpush %v588_v37 }
 0x245   : > { %s803_s8 = spop %802 }
 0x246   : > { %v590_v38 = vstv %s803_s8 }
 0x247   : > { %595 = vst [vmem:[%s424_s19] sm:$0xff] %v590_v38 }
 0x248   : > { %1090 = shalt.err (!%p1087_p11)
}
 0x249   : > { %818 = dma.vmem_to_hbm [thread:$0]  (%p1279_p4), %s617_s22, 128, %s619_s3, %s604_s26  }
 0x24a PF: > { %s1450_s24 = sld [smem:[#allocation16_spill]] }
 0x24b   : > { %s1452_s28 = sld [smem:[#allocation19_spill]] }
 0x250   : > { %s630_s11 = sand.u32 1, %s1450_s24  }
 0x251   : > { %p1453_p12 = scmp.ge.s32.totalorder %s1452_s28, 2  ;;  %s631_s30 = scalar_lea.sflag [#allocation4], %s630_s11 }
 0x253   : > { %p838_p13 = pnand %p1453_p12, %p1287_p9 }
 0x255   : > { %p839_p0 = pneg %p838_p13 }
 0x257   : > { %1128 = dma.done.wait (%p839_p0), %s631_s30, 128  }
 0x258   : > { %1130 = vsyncadd (%p839_p0), %s631_s30, 4294967168  ;;  %s27_s29 = sadd.s32 1, %s1452_s28   ;;  %s1454_s21 = sld [smem:[#allocation17_spill]] }
 0x259   : > { %p24_p2 = scmp.ge.s32.totalorder %s27_s29, 4   ;;  %s1455_s26 = sld [smem:[#allocation22_spill]] }
 0x25a   : > { %s1456_s27 = sld [smem:[#allocation18_spill]]  ;;  %s1458_s24 = smov %s1137_s25 }
 0x25b   : > { %s1457_s28 = sld [smem:[#allocation20_spill]]  ;;  %26 = sbr.rel (!%p24_p2) target bundleno = 14 (0xe), region = 133 }
 0x25e   : > { %s1459_s25 = smov %s1454_s21 }
 0x260   :  { %637 = vsyncpa [#allocation3], 1 }
 0x261   :  { %639 = vsyncpa [#allocation3 + $0x1], 1 }
 0x262   :  { %640 = vsyncpa [#allocation6], 1 }
 0x263   :  { %642 = vsyncpa [#allocation6 + $0x1], 1 }
 0x264   :  { %643 = vsyncpa [#allocation9], 1 }
 0x265   :  { %644 = vsyncpa [#allocation4], 1 }
 0x266   :  { %646 = vsyncpa [#allocation4 + $0x1], 1 }

</bundles_post_ra>
